<compile_context>
chip_gen: v7x
topology: tpu7x:2x2x1
jax: 0.10.0
libtpu: 0.0.40
codegen_flags: <defaults>
</compile_context>

<pallas_src>
import math
import functools

import jax
import jax.numpy as jnp
from jax.experimental import pallas as pl
from jax.experimental.pallas import tpu as pltpu


# ----------------------------- tiling helpers -----------------------------

def _tile(dim, target, align):
    """Largest multiple of `align` that evenly divides `dim` and is <= target,
    falling back to the full dim (full-dim blocks are always layout-legal)."""
    if dim <= target:
        return dim
    t = (target // align) * align
    while t >= align:
        if dim % t == 0:
            return t
        t -= align
    return dim


_PARALLEL1 = pltpu.CompilerParams(dimension_semantics=("parallel",))
_PARALLEL2 = pltpu.CompilerParams(dimension_semantics=("parallel", "parallel"))
_PARALLEL2_ARB = pltpu.CompilerParams(
    dimension_semantics=("parallel", "parallel", "arbitrary"))


# ----------------------------- fused matmul kernels -----------------------------

def _matmul_kernel(act, x_ref, w_ref, b_ref, o_ref, acc_ref):
    """Tiled (M,K)@(K,N): K-axis accumulation in VMEM scratch, fused bias + activation."""
    @pl.when(pl.program_id(2) == 0)
    def _():
        acc_ref[...] = jnp.zeros_like(acc_ref)

    acc_ref[...] += jnp.dot(x_ref[...], w_ref[...],
                            preferred_element_type=jnp.float32)

    @pl.when(pl.program_id(2) == pl.num_programs(2) - 1)
    def _():
        y = acc_ref[...] + b_ref[...]
        if act == 'softplus':     # matches torch.nn.functional.softplus (threshold=20)
            y = jnp.where(y > 20.0, y,
                          jnp.log(1.0 + jnp.exp(jnp.minimum(y, 20.0))))
        elif act == 'silu':
            y = y * jax.nn.sigmoid(y)
        o_ref[...] = y


def matmul(x, w, b, act='none', tm=256, tn=256, tk=512):
    M, K = x.shape
    _, N = w.shape
    tm = _tile(M, tm, 8)
    tn = _tile(N, tn, 128)
    tk = _tile(K, tk, 128)
    grid = (M // tm, N // tn, K // tk)
    return pl.pallas_call(
        functools.partial(_matmul_kernel, act),
        out_shape=jax.ShapeDtypeStruct((M, N), jnp.float32),
        grid=grid,
        in_specs=[pl.BlockSpec((tm, tk), lambda i, j, k: (i, k)),
                  pl.BlockSpec((tk, tn), lambda i, j, k: (k, j)),
                  pl.BlockSpec((1, tn), lambda i, j, k: (0, j))],
        out_specs=pl.BlockSpec((tm, tn), lambda i, j, k: (i, j)),
        scratch_shapes=[pltpu.VMEM((tm, tn), jnp.float32)],
        compiler_params=_PARALLEL2_ARB,
    )(x, w, b.reshape(1, N))


def _norm_mm_kernel(eps, x_ref, g_ref, w_ref, b_ref, o_ref):
    """RMSNorm fused as the matmul prologue (K kept whole so row statistics are exact)."""
    x = x_ref[...]
    ms = jnp.mean(x * x, axis=-1, keepdims=True)
    xn = x * jax.lax.rsqrt(ms + eps) * g_ref[...]
    o_ref[...] = jnp.dot(xn, w_ref[...],
                         preferred_element_type=jnp.float32) + b_ref[...]


def norm_matmul(x, gw, w, b, eps=1e-8, tm=256, tn=256):
    M, K = x.shape
    _, N = w.shape
    tm = _tile(M, tm, 8)
    tn = _tile(N, tn, 128)
    grid = (M // tm, N // tn)
    return pl.pallas_call(
        functools.partial(_norm_mm_kernel, eps),
        out_shape=jax.ShapeDtypeStruct((M, N), jnp.float32),
        grid=grid,
        in_specs=[pl.BlockSpec((tm, K), lambda i, j: (i, 0)),
                  pl.BlockSpec((1, K), lambda i, j: (0, 0)),
                  pl.BlockSpec((K, tn), lambda i, j: (0, j)),
                  pl.BlockSpec((1, tn), lambda i, j: (0, j))],
        out_specs=pl.BlockSpec((tm, tn), lambda i, j: (i, j)),
        compiler_params=_PARALLEL2,
    )(x, gw.reshape(1, K), w, b.reshape(1, N))


def _gated_mm_kernel(has_res, a_ref, b_ref, w_ref, bias_ref, *rest):
    """(silu(a) * b) @ w + bias [+ residual]; K tiled with a VMEM accumulator."""
    if has_res:
        res_ref, o_ref, acc_ref = rest
    else:
        o_ref, acc_ref = rest

    @pl.when(pl.program_id(2) == 0)
    def _():
        acc_ref[...] = jnp.zeros_like(acc_ref)

    a = a_ref[...]
    gated = (a * jax.nn.sigmoid(a)) * b_ref[...]
    acc_ref[...] += jnp.dot(gated, w_ref[...],
                            preferred_element_type=jnp.float32)

    @pl.when(pl.program_id(2) == pl.num_programs(2) - 1)
    def _():
        y = acc_ref[...] + bias_ref[...]
        if has_res:
            y = y + res_ref[...]
        o_ref[...] = y


def gated_matmul(gate_in, val_in, w, bias, residual=None, tm=256, tn=256, tk=512):
    """out = (silu(gate) * val) @ w + bias [+ residual].

    If val_in is None, gate_in has width 2K = concat([gate, val], -1): both halves are
    read from the same HBM array through different BlockSpec index maps (no slice copy)."""
    if val_in is None:
        M, K2 = gate_in.shape
        K = K2 // 2
    else:
        M, K = gate_in.shape
    _, N = w.shape
    tm = _tile(M, tm, 8)
    tn = _tile(N, tn, 128)
    tk = _tile(K, tk, 128)
    grid = (M // tm, N // tn, K // tk)
    koff = K // tk   # block offset of the "value" half when both halves live in one array

    a_spec = pl.BlockSpec((tm, tk), lambda i, j, k: (i, k))
    if val_in is None:
        b_spec = pl.BlockSpec((tm, tk), lambda i, j, k: (i, k + koff))
        ops = [gate_in, gate_in]
    else:
        b_spec = pl.BlockSpec((tm, tk), lambda i, j, k: (i, k))
        ops = [gate_in, val_in]

    in_specs = [a_spec, b_spec,
                pl.BlockSpec((tk, tn), lambda i, j, k: (k, j)),
                pl.BlockSpec((1, tn), lambda i, j, k: (0, j))]
    ops += [w, bias.reshape(1, N)]
    if residual is not None:
        in_specs.append(pl.BlockSpec((tm, tn), lambda i, j, k: (i, j)))
        ops.append(residual)

    return pl.pallas_call(
        functools.partial(_gated_mm_kernel, residual is not None),
        out_shape=jax.ShapeDtypeStruct((M, N), jnp.float32),
        grid=grid,
        in_specs=in_specs,
        out_specs=pl.BlockSpec((tm, tn), lambda i, j, k: (i, j)),
        scratch_shapes=[pltpu.VMEM((tm, tn), jnp.float32)],
        compiler_params=_PARALLEL2_ARB,
    )(*ops)


# ----------------------------- RMSNorm (final norm only) -----------------------------

def _rmsnorm_kernel(eps, x_ref, g_ref, o_ref):
    x = x_ref[...]
    ms = jnp.mean(x * x, axis=-1, keepdims=True)
    o_ref[...] = x * jax.lax.rsqrt(ms + eps) * g_ref[...]


def rmsnorm2d(x, gw, eps=1e-8, tm=512):
    M, D = x.shape
    tm = _tile(M, tm, 8)
    return pl.pallas_call(
        functools.partial(_rmsnorm_kernel, eps),
        out_shape=jax.ShapeDtypeStruct((M, D), jnp.float32),
        grid=(M // tm,),
        in_specs=[pl.BlockSpec((tm, D), lambda i: (i, 0)),
                  pl.BlockSpec((1, D), lambda i: (0, 0))],
        out_specs=pl.BlockSpec((tm, D), lambda i: (i, 0)),
        compiler_params=_PARALLEL1,
    )(x, gw.reshape(1, D))


# ----------------------------- Retention -----------------------------

def _retention_kernel(gamma_ref, q_ref, k_ref, v_ref, gate_ref, o_ref):
    """One (batch, head) per grid step.  The decay mask is generated in-kernel from the
    SMEM-prefetched per-(b,h) gamma (never stored in HBM); the silu(gate) output gating
    is fused as the epilogue."""
    g = pl.program_id(0)
    gamma = gamma_ref[g]
    q = q_ref[0]                                  # (T, hd)
    k = k_ref[0]
    v = v_ref[0]
    T = q.shape[0]
    scale = float(q.shape[1]) ** 0.5

    s = jax.lax.dot_general(q, k, (((1,), (1,)), ((), ())),
                            preferred_element_type=jnp.float32) / scale
    ti = jax.lax.broadcasted_iota(jnp.int32, (T, T), 0)
    tj = jax.lax.broadcasted_iota(jnp.int32, (T, T), 1)
    diff = jnp.maximum(ti - tj, 0).astype(jnp.float32)   # clamp(i-j, min=0), as in reference
    w = s * jnp.exp(-gamma * diff)
    out = jnp.dot(w, v, preferred_element_type=jnp.float32)

    gate = gate_ref[0]
    o_ref[0] = (gate * jax.nn.sigmoid(gate)) * out


def rotary(x):
    # Exact reproduction of the PyTorch RotaryEmbedding (interleaved even/odd pairs).
    # TODO(synk): fold into the retention kernel via pltpu.roll on column-permuted Wq/Wk
    # to avoid the strided ::2 lane shuffle and the extra HBM pass.
    hd = x.shape[-1]
    T = x.shape[-2]
    inv_freq = 1.0 / (10000.0 ** (jnp.arange(0, hd, 2, dtype=jnp.float32) / hd))
    t = jnp.arange(T, dtype=jnp.float32)
    freqs = jnp.einsum('i,j->ij', t, inv_freq)
    emb = jnp.concatenate((freqs, freqs), axis=-1)
    cos = jnp.cos(emb)[None, None]
    sin = jnp.sin(emb)[None, None]
    x1 = x[..., ::2]
    x2 = x[..., 1::2]
    x_rot = jnp.stack((-x2, x1), axis=-1).reshape(x.shape)
    return x * cos + x_rot * sin


def retention(x2, B, T, norm_w, p):
    D = x2.shape[1]
    H = p['heads']
    hd = D // H

    # RMSNorm + fused Q|K|V|Gate projection: one wide (D,4D) matmul instead of 4 + a norm pass.
    qkvg = norm_matmul(x2, norm_w, p['w_qkvg'], p['b_qkvg'])            # (B*T, 4D)

    def to_heads(t2d):
        return t2d.reshape(B, T, H, hd).transpose(0, 2, 1, 3)           # (B, H, T, hd)

    q = rotary(to_heads(qkvg[:, 0 * D:1 * D])).reshape(B * H, T, hd)
    k = rotary(to_heads(qkvg[:, 1 * D:2 * D])).reshape(B * H, T, hd)
    v = to_heads(qkvg[:, 2 * D:3 * D]).reshape(B * H, T, hd)
    gate = to_heads(qkvg[:, 3 * D:4 * D]).reshape(B * H, T, hd)

    gamma_bh = jnp.tile(jax.nn.sigmoid(p['gamma']), B)                  # gamma[g % H], g=b*H+h

    out = pl.pallas_call(
        _retention_kernel,
        out_shape=jax.ShapeDtypeStruct((B * H, T, hd), jnp.float32),
        grid_spec=pltpu.PrefetchScalarGridSpec(
            num_scalar_prefetch=1,
            grid=(B * H,),
            in_specs=[pl.BlockSpec((1, T, hd), lambda g, gm: (g, 0, 0))] * 4,
            out_specs=pl.BlockSpec((1, T, hd), lambda g, gm: (g, 0, 0)),
        ),
        compiler_params=_PARALLEL1,
    )(gamma_bh, q, k, v, gate)

    return out.reshape(B, H, T, hd).transpose(0, 2, 1, 3).reshape(B * T, D)


# ----------------------------- Mamba -----------------------------

def _conv_silu_kernel(xpad_ref, w_ref, b_ref, o_ref):
    """Causal depthwise conv1d (left-padded input) fused with SiLU; one batch row per step."""
    T = o_ref.shape[1]
    K = w_ref.shape[0]
    w = w_ref[...]                                     # (K, D)
    acc = xpad_ref[0, 0:T, :] * w[0:1, :]
    for k in range(1, K):
        acc = acc + xpad_ref[0, k:k + T, :] * w[k:k + 1, :]
    acc = acc + b_ref[...]
    o_ref[0] = acc * jax.nn.sigmoid(acc)
    # TODO(synk): the k-shifted sublane reads could use pltpu.roll to stay 8-row aligned.


def _scan_steps(T):
    """Stride schedule of the reference torch `associative_scan` (Hillis-Steele up-sweep
    followed by its extra down-sweep). Reproduced exactly to match the module's forward."""
    steps = []
    stride = 1
    while stride < T:
        steps.append((stride, stride))           # combine t with t-stride, for t >= stride
        stride *= 2
    stride //= 2
    while stride > 0:
        steps.append((stride, 2 * stride - 1))   # combine t with t-stride, for t >= 2*stride-1
        stride //= 2
    return steps


def _mamba_scan_kernel(delta_ref, bmat_ref, cmat_ref, u_ref, a_ref, dskip_ref,
                       o_ref, hA_ref, hB_ref):
    """Selective scan for one (batch, D-chunk) block.

    State is laid out (T, N, D-chunk): D sits on the 128-lane axis and N=16 only occupies
    sublanes, so every combine step is a full-width VPU op and the final N-reduction is a
    cheap sublane reduce.  The scan itself is the reference associative_scan executed as
    log-depth whole-slab loads/stores on VMEM scratch (no sequential per-timestep loop)."""
    T = o_ref.shape[1]
    dlt = delta_ref[0]                 # (T, td)
    u = u_ref[0]                       # (T, td)
    bm = bmat_ref[0]                   # (T, N)
    cm = cmat_ref[0]                   # (T, N)
    a = a_ref[...]                     # (N, 1)

    hA_ref[...] = jnp.exp(dlt[:, None, :] * a[None, :, :])             # deltaA
    hB_ref[...] = dlt[:, None, :] * bm[:, :, None] * u[:, None, :]     # deltaB_u

    for stride, lo in _scan_steps(T):
        if lo >= T:
            continue
        n = T - lo
        a_hi = hA_ref[pl.ds(lo, n)]
        a_lo = hA_ref[pl.ds(lo - stride, n)]
        b_hi = hB_ref[pl.ds(lo, n)]
        b_lo = hB_ref[pl.ds(lo - stride, n)]
        hA_ref[pl.ds(lo, n)] = a_hi * a_lo
        hB_ref[pl.ds(lo, n)] = b_hi + a_hi * b_lo

    y = jnp.sum(hB_ref[...] * cm[:, :, None], axis=1)                  # (T, td)
    o_ref[0] = y + u * dskip_ref[...]                                  # + u * D skip


def selective_scan(delta, bmat, cmat, u, a_neg, dskip, td_target=512):
    """delta/u: (B,T,D); bmat/cmat: (B,T,N); a_neg: (N,1); dskip: (1,D).
    Grid-parallel over (batch, D-chunks); everything stays batch-major (no transposes)."""
    B, T, D = delta.shape
    N = a_neg.shape[0]
    td = _tile(D, td_target, 128)
    grid = (B, D // td)
    return pl.pallas_call(
        _mamba_scan_kernel,
        out_shape=jax.ShapeDtypeStruct((B, T, D), jnp.float32),
        grid=grid,
        in_specs=[pl.BlockSpec((1, T, td), lambda b, d: (b, 0, d)),
                  pl.BlockSpec((1, T, N), lambda b, d: (b, 0, 0)),
                  pl.BlockSpec((1, T, N), lambda b, d: (b, 0, 0)),
                  pl.BlockSpec((1, T, td), lambda b, d: (b, 0, d)),
                  pl.BlockSpec((N, 1), lambda b, d: (0, 0)),
                  pl.BlockSpec((1, td), lambda b, d: (0, d))],
        out_specs=pl.BlockSpec((1, T, td), lambda b, d: (b, 0, d)),
        scratch_shapes=[pltpu.VMEM((T, N, td), jnp.float32),
                        pltpu.VMEM((T, N, td), jnp.float32)],
        compiler_params=_PARALLEL2,
    )(delta, bmat, cmat, u, a_neg, dskip)


def mamba(x2, B, T, norm_w, p):
    """Returns x + MambaBlock(RMSNorm(x)); the residual add is fused into out_proj."""
    D = x2.shape[1]
    N = p['d_state']
    K = p['d_conv']
    R = p['dt_rank']

    # RMSNorm + in_proj fused (in_proj already produces [x_in | res]).
    xr = norm_matmul(x2, norm_w, p['w_in'], p['b_in'])                  # (B*T, 2D)
    x_in = xr[:, :D].reshape(B, T, D)
    res = xr[:, D:]                                                     # (B*T, D)

    # causal depthwise conv1d + SiLU
    xpad = jnp.pad(x_in, ((0, 0), (K - 1, 0), (0, 0)))
    x_conv = pl.pallas_call(
        _conv_silu_kernel,
        out_shape=jax.ShapeDtypeStruct((B, T, D), jnp.float32),
        grid=(B,),
        in_specs=[pl.BlockSpec((1, T + K - 1, D), lambda b: (b, 0, 0)),
                  pl.BlockSpec((K, D), lambda b: (0, 0)),
                  pl.BlockSpec((1, D), lambda b: (0, 0))],
        out_specs=pl.BlockSpec((1, T, D), lambda b: (b, 0, 0)),
        compiler_params=_PARALLEL1,
    )(xpad, p['conv_w'], p['conv_b'].reshape(1, D))

    xc2 = x_conv.reshape(B * T, D)
    x_ssm = matmul(xc2, p['w_x'], p['b_x'])                             # (B*T, R+2N)
    delta = matmul(x_ssm[:, :R], p['w_dt'], p['b_dt'], act='softplus')  # (B*T, D)
    bmat = x_ssm[:, R:R + N].reshape(B, T, N)
    cmat = x_ssm[:, R + N:].reshape(B, T, N)

    y = selective_scan(delta.reshape(B, T, D), bmat, cmat, x_conv,
                       (-jnp.exp(p['A_log'])).reshape(N, 1),
                       p['D'].reshape(1, D))                            # (B, T, D)

    # (silu(res) * y) @ w_out + b_out + x : gating, projection and residual in one kernel.
    return gated_matmul(res, y.reshape(B * T, D), p['w_out'], p['b_out'],
                        residual=x2)


# ----------------------------- model glue -----------------------------

def dillnet_block(x2, B, T, bp):
    if bp['use_mamba']:
        x2 = mamba(x2, B, T, bp['norm1_w'], bp['mamba'])       # residual fused inside
    else:
        x2 = x2 + retention(x2, B, T, bp['norm1_w'], bp['retention'])
    # SwiGLU FFN: RMSNorm fused into the (W1|W2) matmul; silu-gate, W3, bias and the
    # residual add fused into the second matmul.
    h12 = norm_matmul(x2, bp['norm2_w'], bp['w12'], bp['b12'])  # (B*T, 2*ffn_dim)
    return gated_matmul(h12, None, bp['w3'], bp['b3'], residual=x2)


def dillnet_forward(x, params):
    B, T, D = x.shape
    x2 = x.reshape(B * T, D)
    for bp in params['blocks']:
        x2 = dillnet_block(x2, B, T, bp)
    return rmsnorm2d(x2, params['final_norm_w']).reshape(B, T, D)


# ----------------------------- deterministic parameter init -----------------------------

def init_linear(key, fan_in, fan_out):
    kw, kb = jax.random.split(key)
    bound = 1.0 / math.sqrt(fan_in)
    w = jax.random.uniform(kw, (fan_in, fan_out), jnp.float32, -bound, bound)
    b = jax.random.uniform(kb, (fan_out,), jnp.float32, -bound, bound)
    return w, b


def init_params(key, embed_dim, depth, heads, ffn_dim=None):
    if ffn_dim is None:
        ffn_dim = embed_dim * 4
    d_state, d_conv = 16, 4
    dt_rank = math.ceil(embed_dim / 16)
    blocks = []
    for i in range(depth):
        key, *ks = jax.random.split(key, 11)
        use_mamba = (i % 2 != 0)
        bp = {'use_mamba': use_mamba,
              'norm1_w': jnp.ones((embed_dim,), jnp.float32),
              'norm2_w': jnp.ones((embed_dim,), jnp.float32)}
        w1, b1 = init_linear(ks[0], embed_dim, ffn_dim)
        w2, b2 = init_linear(ks[1], embed_dim, ffn_dim)
        w3, b3 = init_linear(ks[2], ffn_dim, embed_dim)
        bp.update(w12=jnp.concatenate([w1, w2], axis=1),
                  b12=jnp.concatenate([b1, b2]),
                  w3=w3, b3=b3)
        if use_mamba:
            w_in, b_in = init_linear(ks[3], embed_dim, embed_dim * 2)
            cbound = 1.0 / math.sqrt(d_conv)
            conv_w = jax.random.uniform(ks[4], (d_conv, embed_dim), jnp.float32,
                                        -cbound, cbound)   # torch (D,1,K) weight, transposed
            conv_b = jax.random.uniform(ks[8], (embed_dim,), jnp.float32,
                                        -cbound, cbound)
            w_x, b_x = init_linear(ks[5], embed_dim, dt_rank + 2 * d_state)
            w_dt, b_dt = init_linear(ks[6], dt_rank, embed_dim)
            w_out, b_out = init_linear(ks[7], embed_dim, embed_dim)
            A_log = jnp.log(jnp.arange(1, d_state + 1, dtype=jnp.float32))[None, :]
            bp['mamba'] = dict(d_state=d_state, d_conv=d_conv, dt_rank=dt_rank,
                               w_in=w_in, b_in=b_in, conv_w=conv_w, conv_b=conv_b,
                               w_x=w_x, b_x=b_x, w_dt=w_dt, b_dt=b_dt,
                               w_out=w_out, b_out=b_out, A_log=A_log,
                               D=jnp.ones((embed_dim,), jnp.float32))
        else:
            wq, bq = init_linear(ks[3], embed_dim, embed_dim)
            wk, bk = init_linear(ks[4], embed_dim, embed_dim)
            wv, bv = init_linear(ks[5], embed_dim, embed_dim)
            wg, bg = init_linear(ks[6], embed_dim, embed_dim)
            gamma = jax.random.normal(ks[7], (heads,), jnp.float32)
            bp['retention'] = dict(
                heads=heads,
                w_qkvg=jnp.concatenate([wq, wk, wv, wg], axis=1),
                b_qkvg=jnp.concatenate([bq, bk, bv, bg]),
                gamma=gamma)
        blocks.append(bp)
    return {'blocks': blocks, 'final_norm_w': jnp.ones((embed_dim,), jnp.float32)}


# ----------------------------- main -----------------------------

if __name__ == "__main__":
    key = jax.random.PRNGKey(0)
    B, T, embed_dim, depth, heads = 2, 8, 64, 2, 8
    kx, kp = jax.random.split(key)
    x = jax.random.normal(kx, (B, T, embed_dim), jnp.float32)
    params = init_params(kp, embed_dim, depth, heads)

    out = dillnet_forward(x, params)
    out = jax.block_until_ready(out)

    assert out.shape == (B, T, embed_dim)
    assert bool(jnp.all(jnp.isfinite(out)))
    print("KERNEL_OK")
</pallas_src>

<mosaic_0001>
module attributes {stable_mosaic.version = 11 : i64} {
  func.func @_norm_mm_kernel(%arg0: i32, %arg1: i32, %arg2: memref<16x64xf32, #tpu.memory_space<vmem>>, %arg3: memref<1x64xf32, #tpu.memory_space<vmem>>, %arg4: memref<64x256xf32, #tpu.memory_space<vmem>>, %arg5: memref<1x256xf32, #tpu.memory_space<vmem>>, %arg6: memref<16x256xf32, #tpu.memory_space<vmem>>) attributes {dimension_semantics = [#tpu.dimension_semantics<parallel>, #tpu.dimension_semantics<parallel>], iteration_bounds = array<i64: 1, 1>, scalar_prefetch = 0 : i64, scratch_operands = 0 : i64, tpu.core_type = #tpu.core_type<tc>, window_params = [{transform_indices = @transform_0, window_bounds = array<i64: 16, 64>}, {pipeline_mode = #tpu.pipeline_mode<synchronous>, transform_indices = @transform_1, window_bounds = array<i64: 1, 64>}, {transform_indices = @transform_2, window_bounds = array<i64: 64, 256>}, {transform_indices = @transform_3, window_bounds = array<i64: 1, 256>}, {transform_indices = @transform_4, window_bounds = array<i64: 16, 256>}]} {
    %c0 = arith.constant 0 : index
    %c0_0 = arith.constant 0 : index
    %0 = vector.load %arg2[%c0, %c0_0] : memref<16x64xf32, #tpu.memory_space<vmem>>, vector<16x64xf32>
    %1 = arith.mulf %0, %0 : vector<16x64xf32>
    %cst = arith.constant dense<0.000000e+00> : vector<16xf32>
    %2 = vector.multi_reduction <add>, %1, %cst [1] : vector<16x64xf32> to vector<16xf32>
    %3 = vector.shape_cast %2 : vector<16xf32> to vector<16x1xf32>
    %cst_1 = arith.constant 6.400000e+01 : f32
    %4 = vector.broadcast %cst_1 : f32 to vector<16x1xf32>
    %5 = arith.divf %3, %4 : vector<16x1xf32>
    %cst_2 = arith.constant 9.99999993E-9 : f32
    %6 = vector.broadcast %cst_2 : f32 to vector<16x1xf32>
    %7 = arith.addf %5, %6 : vector<16x1xf32>
    %8 = math.rsqrt %7 : vector<16x1xf32>
    %9 = vector.broadcast %8 : vector<16x1xf32> to vector<16x64xf32>
    %10 = arith.mulf %0, %9 : vector<16x64xf32>
    %c0_3 = arith.constant 0 : index
    %c0_4 = arith.constant 0 : index
    %11 = vector.load %arg3[%c0_3, %c0_4] : memref<1x64xf32, #tpu.memory_space<vmem>>, vector<1x64xf32>
    %12 = vector.broadcast %11 : vector<1x64xf32> to vector<16x64xf32>
    %13 = arith.mulf %10, %12 : vector<16x64xf32>
    %c0_5 = arith.constant 0 : index
    %c0_6 = arith.constant 0 : index
    %14 = vector.load %arg4[%c0_5, %c0_6] : memref<64x256xf32, #tpu.memory_space<vmem>>, vector<64x256xf32>
    %cst_7 = arith.constant dense<0.000000e+00> : vector<16x256xf32>
    %15 = tpu.matmul %13, %14, %cst_7 {dimension_numbers = #tpu.dot_dimension_numbers<[1], [0], [0], [1], [0, 0, 1, 1], [], []>} : vector<16x64xf32>, vector<64x256xf32>, vector<16x256xf32> -> vector<16x256xf32>
    %c0_8 = arith.constant 0 : index
    %c0_9 = arith.constant 0 : index
    %16 = vector.load %arg5[%c0_8, %c0_9] : memref<1x256xf32, #tpu.memory_space<vmem>>, vector<1x256xf32>
    %17 = vector.broadcast %16 : vector<1x256xf32> to vector<16x256xf32>
    %18 = arith.addf %15, %17 : vector<16x256xf32>
    %c0_10 = arith.constant 0 : index
    %c0_11 = arith.constant 0 : index
    %19 = vector.load %arg6[%c0_10, %c0_11] : memref<16x256xf32, #tpu.memory_space<vmem>>, vector<16x256xf32>
    tpu.vector_store %arg6[%c0_10, %c0_11], %18 {strides = array<i32>} : memref<16x256xf32, #tpu.memory_space<vmem>>, vector<16x256xf32>,
    return
  }
  func.func @transform_0(%arg0: i32, %arg1: i32) -> (i32, i32) {
    %c0_i32 = arith.constant 0 : i32
    %c0_i32_0 = arith.constant 0 : i32
    return %arg0, %c0_i32 : i32, i32
  }
  func.func @transform_1(%arg0: i32, %arg1: i32) -> (i32, i32) {
    %c0_i32 = arith.constant 0 : i32
    %c0_i32_0 = arith.constant 0 : i32
    %c0_i32_1 = arith.constant 0 : i32
    return %c0_i32, %c0_i32_0 : i32, i32
  }
  func.func @transform_2(%arg0: i32, %arg1: i32) -> (i32, i32) {
    %c0_i32 = arith.constant 0 : i32
    %c0_i32_0 = arith.constant 0 : i32
    return %c0_i32, %arg1 : i32, i32
  }
  func.func @transform_3(%arg0: i32, %arg1: i32) -> (i32, i32) {
    %c0_i32 = arith.constant 0 : i32
    %c0_i32_0 = arith.constant 0 : i32
    return %c0_i32, %arg1 : i32, i32
  }
  func.func @transform_4(%arg0: i32, %arg1: i32) -> (i32, i32) {
    %c0_i32 = arith.constant 0 : i32
    return %arg0, %arg1 : i32, i32
  }
}

</mosaic_0001>

<bundles_post_ra>
// kernel: tpu_custom_call.1
= control target key start
LH: loop header
LB: loop body
LE: loop exit
PB: predicated region body
PF: predicated region fallthrough
CT: control target
= control target key end

     0   :  { %9 = vsyncpa [#allocation3], 0  ;;  %s409_s0 = inlined_call_operand.hbm [shape: f32[16,64], index: 0, kind: input, shape index: {}]   ;;  %s410_s1 = inlined_call_operand.vmem [shape: f32[1,64], index: 1, kind: input, shape index: {}]   ;;  %s411_s2 = inlined_call_operand.hbm [shape: f32[64,256], index: 2, kind: input, shape index: {}]   ;;  %s412_s3 = inlined_call_operand.vmem [shape: f32[1,256], index: 3, kind: input, shape index: {}]   ;;  %s413_s4 = inlined_call_operand.hbm [shape: f32[16,256], index: 4, kind: output, shape index: {}]  }
   0x1   :  { %10 = vsyncpa [#allocation6], 0 }
   0x2   :  { %11 = vsyncpa [#allocation4], 0  ;;  %s319_s15 = smov [#allocation2]   ;;  %s247_s19 = scalar_lea.hbm %s409_s0, 256 }
   0x3   :  { %s17_s16 = sshll.u32 %s319_s15, 4  ;;  %p248_p0 = scmp.ne.s32.totalorder %s409_s0, %s247_s19  ;;  %s18_s16 = int_to_ptr.vmem [resolvable:$true] %s17_s16 }
   0x4   :  { %p251_p1 = scmp.lt.u32.totalorder %s247_s19, %s409_s0 }
   0x6   :  { %p253_p2 = pnand %p251_p1, %p248_p0 }
   0x8   :  { %256 = shalt.err (!%p253_p2)
}
   0x9   :  { %s257_s24 = scalar_lea.vmem %s18_s16, 256  ;;  %p262_p4 = scmp.lt.s32.totalorder %s18_s16, %s18_s16 }
   0xa   :  { %p258_p3 = scmp.ne.s32.totalorder %s18_s16, %s257_s24  ;;  %p263_p5 = scmp.lt.s32.totalorder %s257_s24, %s257_s24 }
   0xc   :  { %p264_p6 = por %p263_p5, %p262_p4 }
   0xe   :  { %p265_p7 = pnand %p264_p6, %p258_p3 }
  0x10   :  { %268 = shalt.err (!%p265_p7)
}
  0x11   :  { %s320_s25 = smov 128   ;;  %s321_s26 = smov 8  }
  0x12   :  { %23 = dma.hbm_to_vmem [thread:$0]  %s409_s0, 256, %s18_s16, [#allocation3], %s320_s25, %s320_s25, %s321_s26  }
  0x13   :  { %s322_s29 = smov [#allocation5]   ;;  %s269_s7 = scalar_lea.hbm %s411_s2, 2048 }
  0x14   :  { %s31_s30 = sshll.u32 %s322_s29, 4  ;;  %p270_p8 = scmp.ne.s32.totalorder %s411_s2, %s269_s7  ;;  %s32_s30 = int_to_ptr.vmem [resolvable:$true] %s31_s30 }
  0x15   :  { %p273_p9 = scmp.lt.u32.totalorder %s269_s7, %s411_s2 }
  0x17   :  { %p275_p10 = pnand %p273_p9, %p270_p8 }
  0x19   :  { %278 = shalt.err (!%p275_p10)
}
  0x1a   :  { %s279_s12 = scalar_lea.vmem %s32_s30, 2048  ;;  %p284_p12 = scmp.lt.s32.totalorder %s32_s30, %s32_s30 }
  0x1b   :  { %p280_p11 = scmp.ne.s32.totalorder %s32_s30, %s279_s12  ;;  %p285_p13 = scmp.lt.s32.totalorder %s279_s12, %s279_s12 }
  0x1d   :  { %p286_p0 = por %p285_p13, %p284_p12 }
  0x1f   :  { %p287_p1 = pnand %p286_p0, %p280_p11 }
  0x21   :  { %290 = shalt.err (!%p287_p1)
}
  0x22   :  { %s323_s0 = smov 256   ;;  %s324_s13 = smov 16  }
  0x23   :  { %37 = dma.hbm_to_vmem [thread:$0]  %s411_s2, 2048, %s32_s30, [#allocation6], %s323_s0, %s323_s0, %s324_s13  }
  0x24   :  { %313 = dma.done.wait [#allocation3], 256  }
  0x25   :  { %314 = vsyncadd [#allocation3], 4294967040 }
  0x26   :  { %315 = dma.done.wait [#allocation6], 2048  }
  0x27   :  { %316 = vsyncadd [#allocation6], 4294965248  ;;  %v46_v0 = vld [vmem:[#allocation2] sm:$0xff]  ;;  %vm50_vm0 = vcmask 523264   ;;  %v379_v1 = vld [vmem:[#allocation2 + $0x8] sm:$0xff]  ;;  %v325_v25 = vmov 0.0   ;;  %v93_v44 = vlaneseq }
  0x28   :  { %v48_v2 = vmul.f32 %v46_v0, %v46_v0  ;;  %v49_v3 = vmul.f32 %v379_v1, %v379_v1  ;;  %v76_v6 = vld [vmem:[#allocation5 + $0x8] sm:$0xff]  ;;  %v78_v7 = vld [vmem:[#allocation5 + $0x18] sm:$0xff]  ;;  %v75_v9 = vld [vmem:[#allocation5] sm:$0xff]  ;;  %173 = vmatprep.mubr.f32.mxu0 %v325_v25  ;;  %179 = vmatprep.mubr.f32.mxu1 %v325_v25 }
  0x29   :  { %v211_v8 = vpack.c.bf16 %v78_v7, %v76_v6  ;;  %v77_v10 = vld [vmem:[#allocation5 + $0x10] sm:$0xff]  ;;  %v80_v12 = vld [vmem:[#allocation5 + $0x28] sm:$0xff]  ;;  %v82_v13 = vld [vmem:[#allocation5 + $0x38] sm:$0xff]  ;;  %v94_v45 = vshrl.u32 %v93_v44, 7 }
  0x2a   :  { %v51_v4 = vsel %vm50_vm0, %v48_v2, 0.0  ;;  %v54_v5 = vsel %vm50_vm0, %v49_v3, 0.0  ;;  %v213_v11 = vpack.c.bf16 %v77_v10, %v75_v9  ;;  %v215_v14 = vpack.c.bf16 %v82_v13, %v80_v12  ;;  %v79_v15 = vld [vmem:[#allocation5 + $0x20] sm:$0xff]  ;;  %v81_v16 = vld [vmem:[#allocation5 + $0x30] sm:$0xff]  ;;  %v84_v18 = vld [vmem:[#allocation5 + $0x48] sm:$0xff] }
  0x2b   :  { %52 = vadd.xlane.f32.xlu0 %v51_v4  ;;  %212 = vmatprep.subr.bf16.mxu0 %v211_v8  ;;  %v217_v17 = vpack.c.bf16 %v81_v16, %v79_v15  ;;  %v86_v19 = vld [vmem:[#allocation5 + $0x58] sm:$0xff]  ;;  %v83_v20 = vld [vmem:[#allocation5 + $0x40] sm:$0xff]  ;;  %v85_v22 = vld [vmem:[#allocation5 + $0x50] sm:$0xff]  ;;  %v95_v46 = vsub.s32 0, %v94_v45  ;;  %v99_v48 = vsub.s32 1, %v94_v45 }
  0x2c   :  { %227 = vmatprep.subr.bf16.mxu1 %v211_v8  ;;  %214 = vmatpush1.bf16.msra.mxu0 %v213_v11  ;;  %v219_v21 = vpack.c.bf16 %v86_v19, %v84_v18  ;;  %v88_v23 = vld [vmem:[#allocation5 + $0x68] sm:$0xff]  ;;  %v90_v24 = vld [vmem:[#allocation5 + $0x78] sm:$0xff]  ;;  %v221_v26 = vpack.c.bf16 %v85_v22, %v83_v20  ;;  %v87_v28 = vld [vmem:[#allocation5 + $0x60] sm:$0xff] }
  0x2d   :  { %231 = vmatpush1.bf16.msra.mxu1 %v213_v11  ;;  %216 = vmatprep.subr.bf16.mxu0 %v215_v14  ;;  %v223_v27 = vpack.c.bf16 %v90_v24, %v88_v23  ;;  %v89_v29 = vld [vmem:[#allocation5 + $0x70] sm:$0xff] }
  0x2e   :  { %228 = vmatprep.subr.bf16.mxu1 %v215_v14  ;;  %v225_v30 = vpack.c.bf16 %v89_v29, %v87_v28  ;;  %v208_v38 = vld [vmem:[%s410_s1] ss:$0 sm:$0xff]  ;;  %s326_s1 = smov [#allocation7]  }
  0x2f   :  { %55 = vadd.xlane.f32.xlu0 %v54_v5  ;;  %v91_v47 = vld [vmem:[%s412_s3] sm:$0x3]  ;;  %s195_s19 = sshll.u32 %s326_s1, 4  ;;  %s196_s19 = int_to_ptr.vmem [resolvable:$true] %s195_s19 }
  0x30   :  { %218 = vmatpush1.bf16.msra.mxu0 %v217_v17  ;;  %v96_v49 = vrot.slane %v91_v47, %v95_v46  ;;  %v100_v50 = vrot.slane %v91_v47, %v99_v48  ;;  %s291_s20 = scalar_lea.vmem %s196_s19, 512  ;;  %p296_p3 = scmp.lt.s32.totalorder %s196_s19, %s196_s19 }
  0x31   :  { %232 = vmatpush1.bf16.msra.mxu1 %v217_v17  ;;  %220 = vmatprep.subr.bf16.mxu0 %v219_v21  ;;  %p292_p2 = scmp.ne.s32.totalorder %s196_s19, %s291_s20  ;;  %p297_p4 = scmp.lt.s32.totalorder %s291_s20, %s291_s20 }
  0x32   :  { %229 = vmatprep.subr.bf16.mxu1 %v219_v21 }
  0x33   :  { %p298_p5 = por %p297_p4, %p296_p3 }
  0x34   :  { %222 = vmatpush1.bf16.msra.mxu0 %v221_v26 }
  0x35   :  { %233 = vmatpush1.bf16.msra.mxu1 %v221_v26  ;;  %224 = vmatprep.subr.bf16.mxu0 %v223_v27  ;;  %p299_p6 = pnand %p298_p5, %p292_p2 }
  0x36   :  { %230 = vmatprep.subr.bf16.mxu1 %v223_v27 }
  0x38   :  { %226 = vmatpush1.bf16.msra.mxu0 %v225_v30 }
  0x39   :  { %234 = vmatpush1.bf16.msra.mxu1 %v225_v30 }
  0xb8   :  { %v53_v31 = vpop.xlane.xlu0 %52 }
  0xb9   :  { %v58_v32 = vmul.f32 0.015625, %v53_v31 }
  0xbb   :  { %v60_v33 = vadd.f32 1e-08, %v58_v32 }
  0xbc   :  { %v56_v34 = vpop.xlane.xlu0 %55 }
  0xbd   :  { %243 = vrsqrt.f32 %v60_v33  ;;  %v59_v35 = vmul.f32 0.015625, %v56_v34 }
  0xbf   :  { %v61_v36 = vadd.f32 1e-08, %v59_v35 }
  0xc1   :  { %245 = vrsqrt.f32 %v61_v36 }
  0xc7   :  { %v244_v37 = vpop.eup %243 }
  0xc8   :  { %v64_v39 = vmul.f32 %v244_v37, %v46_v0 }
  0xca   :  { %v73_v40 = vmul.f32 %v208_v38, %v64_v39 }
  0xcb   :  { %v246_v41 = vpop.eup %245 }
  0xcc   :  { %209 = vmatmul.mubr.msk.f32.vlgmr.msra.gmra.mrb[0].mxu0 %vm50_vm0, %v73_v40  ;;  %v65_v42 = vmul.f32 %v246_v41, %v379_v1 }
  0xce   :  { %v74_v43 = vmul.f32 %v208_v38, %v65_v42 }
  0xd0   :  { %210 = vmatmul.mubr.msk.f32.vlgmr.msra.gmra.mrb[0].mxu1 %vm50_vm0, %v74_v43 }
 0x19f   :  { %v175_v51 = vpop.f32.mrb[0].mxu0 }
 0x1a0   :  { %v176_v52 = vadd.f32 %v175_v51, %v96_v49  ;;  %v177_v53 = vpop.f32.mrb[1].mxu0 }
 0x1a1   :  { %v178_v54 = vadd.f32 %v177_v53, %v100_v50 }
 0x1a2   :  { %186 = vst [vmem:[#allocation7] sm:$0xff] %v176_v52 }
 0x1a3   :  { %187 = vst [vmem:[#allocation7 + $0x8] sm:$0xff] %v178_v54  ;;  %v181_v55 = vpop.f32.mrb[0].mxu1 }
 0x1a4   :  { %v182_v56 = vadd.f32 %v181_v55, %v96_v49  ;;  %v183_v57 = vpop.f32.mrb[1].mxu1 }
 0x1a5   :  { %v184_v58 = vadd.f32 %v183_v57, %v100_v50 }
 0x1a6   :  { %188 = vst [vmem:[#allocation7 + $0x10] sm:$0xff] %v182_v56 }
 0x1a7   :  { %189 = vst [vmem:[#allocation7 + $0x18] sm:$0xff] %v184_v58 }
 0x1a8   :  { %302 = shalt.err (!%p299_p6)
}
 0x1a9   :  { %s303_s22 = scalar_lea.hbm %s413_s4, 512 }
 0x1aa   :  { %p304_p7 = scmp.ne.s32.totalorder %s413_s4, %s303_s22  ;;  %p307_p8 = scmp.lt.u32.totalorder %s303_s22, %s413_s4 }
 0x1ac   :  { %p309_p9 = pnand %p307_p8, %p304_p7 }
 0x1ae   :  { %312 = shalt.err (!%p309_p9)
}
 0x1af   :  { %201 = dma.vmem_to_hbm [thread:$0]  %s196_s19, 512, %s413_s4, [#allocation4], %s323_s0, %s323_s0, %s324_s13  }
 0x1b0   :  { %317 = dma.done.wait [#allocation4], 512  }
 0x1b1   :  { %318 = vsyncadd [#allocation4], 4294966784 }
 0x1b2   :  { %205 = vsyncpa [#allocation3], 1 }
 0x1b3   :  { %206 = vsyncpa [#allocation6], 1 }
 0x1b4   :  { %207 = vsyncpa [#allocation4], 1 }

</bundles_post_ra>
